<compile_context>
chip_gen: v7x
topology: tpu7x:2x2x1
jax: 0.10.0
libtpu: 0.0.40
codegen_flags: <defaults>
</compile_context>

<pallas_src>
import functools

import jax
import jax.numpy as jnp
from jax.experimental import pallas as pl
from jax.experimental.pallas import tpu as pltpu


def _round_up(a, b):
    return ((a + b - 1) // b) * b


def _cdiv(a, b):
    return -(-a // b)


def _choose_tile_rows(lane_rows, max_tile_rows, *, min_tile_rows=512,
                      target_blocks=4):
    """Pick a tile height (multiple of 8) so the grid has >=target_blocks
    blocks once there is enough work, while keeping tiles >= min_tile_rows
    rows (>=85% of HBM roofline) and <= max_tile_rows (VMEM budget)."""
    lr8 = _round_up(lane_rows, 8)
    max_tr = _round_up(max(min(max_tile_rows, lr8), 8), 8)
    min_tr = min(min_tile_rows, max_tr)
    if lr8 <= min_tr:
        return lr8
    g = min(max(target_blocks, _cdiv(lr8, max_tr)), _cdiv(lr8, min_tr))
    return min(_round_up(_cdiv(lr8, g), 8), max_tr)


def _translate_kernel(trans_ref, z_ref, coord_ref, out_ref, *, num_planes,
                      resolution):
    """Translate x/y of every point whose z matches a plane.

    trans_ref : SMEM (num_planes, 2) int32    (scalar-prefetched)
    z_ref     : SMEM (num_planes,)   float32  (scalar-prefetched)
    coord_ref : VMEM (3, TR, 128)    float32  rows: x, y, z (lane-dense)
    out_ref   : VMEM (3, TR, 128)    float32  (HBM buffer aliased to input)
    """
    # Read rows straight off the ref; keep the live set to {z, dx, dy}.
    z = coord_ref[2]                                        # (TR, 128)
    dx = jnp.zeros_like(z)
    dy = jnp.zeros_like(z)
    # num_planes is tiny and static -> unrolled Python loop, pure VPU work.
    # NOTE: exact float equality on z is faithful to the numpy reference.
    for d in range(num_planes):
        m = z == z_ref[d]
        tx = trans_ref[d, 0].astype(jnp.float32) * resolution
        ty = trans_ref[d, 1].astype(jnp.float32) * resolution
        dx = dx + jnp.where(m, tx, jnp.float32(0.0))
        dy = dy + jnp.where(m, ty, jnp.float32(0.0))
    # Full-sublane, unmasked stores (TR is a multiple of 8).
    out_ref[0] = coord_ref[0] + dx
    out_ref[1] = coord_ref[1] + dy
    out_ref[2] = z                                          # z passes through


@functools.partial(jax.jit, static_argnames=("resolution", "max_tile_rows"))
def _apply_translation_impl(coords, translation, observe_z, *, resolution,
                            max_tile_rows):
    n = coords.shape[0]
    num_planes = observe_z.shape[0]

    lane_rows = max(_cdiv(n, 128), 1)                 # 128-point rows
    tr = _choose_tile_rows(lane_rows, max_tile_rows)
    rows_pad = _round_up(lane_rows, tr)
    n_pad = rows_pad * 128
    grid = rows_pad // tr

    # Layout plumbing (fused by XLA under this jit): (N, 3) -> (3, M, 128).
    ct = coords.astype(jnp.float32).T                 # (3, N)
    ct = jnp.pad(ct, ((0, 0), (0, n_pad - n)))        # (3, n_pad)
    ct = ct.reshape(3, rows_pad, 128)                 # lane-dense SoA tiles

    kernel = functools.partial(
        _translate_kernel, num_planes=num_planes, resolution=float(resolution))

    out = pl.pallas_call(
        kernel,
        out_shape=jax.ShapeDtypeStruct((3, rows_pad, 128), jnp.float32),
        grid_spec=pltpu.PrefetchScalarGridSpec(
            num_scalar_prefetch=2,            # translation, observe_z -> SMEM
            grid=(grid,),
            in_specs=[pl.BlockSpec((3, tr, 128), lambda i, t, z: (0, i, 0))],
            out_specs=pl.BlockSpec((3, tr, 128), lambda i, t, z: (0, i, 0)),
        ),
        compiler_params=pltpu.CompilerParams(
            dimension_semantics=("parallel",),        # megacore on v7x
            vmem_limit_bytes=32 * 1024 * 1024),
        cost_estimate=pl.CostEstimate(
            flops=(6 * num_planes + 2) * n_pad,
            transcendentals=0,
            bytes_accessed=6 * n_pad * 4),
        # Coordinate slab updated in place: input index 2 counts the two
        # scalar-prefetch operands (translation, observe_z) before it.
        input_output_aliases={2: 0},
    )(translation, observe_z, ct)

    # The padded tail of the (aliased) buffer may contain "translated"
    # garbage (padded z == 0.0); always slice before reuse.
    return out.reshape(3, n_pad)[:, :n].T             # (N, 3)


def apply_translation(coords, translation, observe_z, resolution, *,
                      max_tile_rows=2048):
    """coords: (N, 3) float, translation: (D, 2) int, observe_z: (D,)."""
    return _apply_translation_impl(
        coords,
        jnp.asarray(translation, jnp.int32),
        jnp.asarray(observe_z, jnp.float32),
        resolution=float(resolution),
        max_tile_rows=int(max_tile_rows))


class RandomTranslation:
    """JAX / Pallas port of the PyTorch RandomTranslation module."""

    def __init__(self, max_translation, base_plane, observe_z, resolution):
        self._max_translation = max_translation
        self._base_plane = base_plane
        self._observe_z = jnp.asarray(observe_z, jnp.float32)
        self._resolution = resolution

    def __call__(self, observe_coordinates, key):
        d = self._observe_z.shape[0]
        # numpy.random.randint(low, high) samples [low, high); jax matches.
        translation = jax.random.randint(
            key, (d, 2), -self._max_translation, self._max_translation,
            dtype=jnp.int32)
        translation = translation.at[self._base_plane].set(0)

        coord = apply_translation(observe_coordinates, translation,
                                  self._observe_z, self._resolution)

        rows = [i for i in range(d) if i != self._base_plane]
        return coord, translation[jnp.asarray(rows)].reshape(-1)


def _reference(coords, translation, observe_z, resolution):
    """Pure-JAX reference of the per-point translation (for verification)."""
    coords = coords.astype(jnp.float32)
    out_xy = coords[:, :2]
    z = coords[:, 2:3]
    for d in range(observe_z.shape[0]):
        m = (z == observe_z[d])
        out_xy = out_xy + m * (translation[d].astype(jnp.float32) * resolution)
    return jnp.concatenate([out_xy, z], axis=1)


if __name__ == "__main__":
    key = jax.random.PRNGKey(0)
    k_xy, k_z, k_trans, k_xy2, k_z2, k_xy3, k_z3 = jax.random.split(key, 7)

    observe_z = [0.0, 1.0, 2.0]
    resolution = 0.5
    observe_z_arr = jnp.asarray(observe_z, jnp.float32)

    # ---- Test 1: module path, single-tile (N = 256) ------------------------
    num_points = 256
    xy = jax.random.uniform(k_xy, (num_points, 2), jnp.float32) * 10.0
    z_idx = jax.random.randint(k_z, (num_points,), 0, len(observe_z))
    z = observe_z_arr[z_idx][:, None]
    coords = jnp.concatenate([xy, z], axis=1)              # (256, 3)

    module = RandomTranslation(max_translation=5, base_plane=0,
                               observe_z=observe_z, resolution=resolution)
    out_coords, flat_trans = module(coords, k_trans)
    out_coords = jax.block_until_ready(out_coords)
    flat_trans = jax.block_until_ready(flat_trans)

    trans_full = jax.random.randint(k_trans, (len(observe_z), 2), -5, 5,
                                    dtype=jnp.int32).at[0].set(0)
    ref = _reference(coords, trans_full, observe_z_arr, resolution)
    assert out_coords.shape == coords.shape
    assert flat_trans.shape == (2 * (len(observe_z) - 1),)
    assert jnp.allclose(out_coords, ref, atol=1e-6)

    # ---- Test 2: multi-step grid, N not a multiple of 128 ------------------
    num_points2 = 5000
    xy2 = jax.random.uniform(k_xy2, (num_points2, 2), jnp.float32) * 10.0
    z_idx2 = jax.random.randint(k_z2, (num_points2,), 0, len(observe_z))
    z2 = observe_z_arr[z_idx2][:, None]
    coords2 = jnp.concatenate([xy2, z2], axis=1)           # (5000, 3)
    trans2 = jnp.array([[0, 0], [3, -2], [-4, 1]], jnp.int32)

    out2 = apply_translation(coords2, trans2, observe_z_arr, resolution,
                             max_tile_rows=8)              # forces a 5-step grid
    out2 = jax.block_until_ready(out2)
    ref2 = _reference(coords2, trans2, observe_z_arr, resolution)
    assert out2.shape == coords2.shape
    assert jnp.allclose(out2, ref2, atol=1e-6)

    # ---- Test 3: default tiling heuristic, multi-block grid ----------------
    num_points3 = 70000
    xy3 = jax.random.uniform(k_xy3, (num_points3, 2), jnp.float32) * 10.0
    z_idx3 = jax.random.randint(k_z3, (num_points3,), 0, len(observe_z))
    z3 = observe_z_arr[z_idx3][:, None]
    coords3 = jnp.concatenate([xy3, z3], axis=1)           # (70000, 3)
    trans3 = jnp.array([[0, 0], [-5, 4], [2, -3]], jnp.int32)

    out3 = apply_translation(coords3, trans3, observe_z_arr, resolution)
    out3 = jax.block_until_ready(out3)
    ref3 = _reference(coords3, trans3, observe_z_arr, resolution)
    assert out3.shape == coords3.shape
    assert jnp.allclose(out3, ref3, atol=1e-6)

    print("KERNEL_OK")
</pallas_src>

<mosaic_0001>
module attributes {stable_mosaic.version = 11 : i64} {
  func.func @_translate_kernel(%arg0: i32, %arg1: memref<3x2xi32, #tpu.memory_space<smem>>, %arg2: memref<3xf32, #tpu.memory_space<smem>>, %arg3: memref<3x8x128xf32, #tpu.memory_space<vmem>>, %arg4: memref<3x8x128xf32, #tpu.memory_space<vmem>>) attributes {dimension_semantics = [#tpu.dimension_semantics<parallel>], iteration_bounds = array<i64: 1>, scalar_prefetch = 2 : i64, scratch_operands = 0 : i64, tpu.core_type = #tpu.core_type<tc>, window_params = [{transform_indices = @transform_0, window_bounds = array<i64: 3, 8, 128>}, {transform_indices = @transform_1, window_bounds = array<i64: 3, 8, 128>}]} {
    %c2 = arith.constant 2 : index
    %c0 = arith.constant 0 : index
    %c0_0 = arith.constant 0 : index
    %0 = vector.load %arg3[%c2, %c0, %c0_0] : memref<3x8x128xf32, #tpu.memory_space<vmem>>, vector<1x8x128xf32>
    %1 = vector.shape_cast %0 : vector<1x8x128xf32> to vector<8x128xf32>
    %cst = arith.constant 0.000000e+00 : f32
    %2 = vector.broadcast %cst : f32 to vector<8x128xf32>
    %cst_1 = arith.constant 0.000000e+00 : f32
    %3 = vector.broadcast %cst_1 : f32 to vector<8x128xf32>
    %c0_2 = arith.constant 0 : index
    %4 = memref.load %arg2[%c0_2] : memref<3xf32, #tpu.memory_space<smem>>
    %5 = vector.broadcast %4 : f32 to vector<8x128xf32>
    %6 = arith.cmpf oeq, %1, %5 : vector<8x128xf32>
    %c0_3 = arith.constant 0 : index
    %c0_4 = arith.constant 0 : index
    %7 = memref.load %arg1[%c0_3, %c0_4] : memref<3x2xi32, #tpu.memory_space<smem>>
    %8 = arith.sitofp %7 : i32 to f32
    %cst_5 = arith.constant 5.000000e-01 : f32
    %9 = arith.mulf %8, %cst_5 : f32
    %c0_6 = arith.constant 0 : index
    %c1 = arith.constant 1 : index
    %10 = memref.load %arg1[%c0_6, %c1] : memref<3x2xi32, #tpu.memory_space<smem>>
    %11 = arith.sitofp %10 : i32 to f32
    %cst_7 = arith.constant 5.000000e-01 : f32
    %12 = arith.mulf %11, %cst_7 : f32
    %cst_8 = arith.constant 0.000000e+00 : f32
    %13 = vector.broadcast %9 : f32 to vector<8x128xf32>
    %14 = vector.broadcast %cst_8 : f32 to vector<8x128xf32>
    %15 = arith.select %6, %13, %14 : vector<8x128xi1>, vector<8x128xf32>
    %16 = arith.addf %2, %15 : vector<8x128xf32>
    %cst_9 = arith.constant 0.000000e+00 : f32
    %17 = vector.broadcast %12 : f32 to vector<8x128xf32>
    %18 = vector.broadcast %cst_9 : f32 to vector<8x128xf32>
    %19 = arith.select %6, %17, %18 : vector<8x128xi1>, vector<8x128xf32>
    %20 = arith.addf %3, %19 : vector<8x128xf32>
    %c1_10 = arith.constant 1 : index
    %21 = memref.load %arg2[%c1_10] : memref<3xf32, #tpu.memory_space<smem>>
    %22 = vector.broadcast %21 : f32 to vector<8x128xf32>
    %23 = arith.cmpf oeq, %1, %22 : vector<8x128xf32>
    %c1_11 = arith.constant 1 : index
    %c0_12 = arith.constant 0 : index
    %24 = memref.load %arg1[%c1_11, %c0_12] : memref<3x2xi32, #tpu.memory_space<smem>>
    %25 = arith.sitofp %24 : i32 to f32
    %cst_13 = arith.constant 5.000000e-01 : f32
    %26 = arith.mulf %25, %cst_13 : f32
    %c1_14 = arith.constant 1 : index
    %c1_15 = arith.constant 1 : index
    %27 = memref.load %arg1[%c1_14, %c1_15] : memref<3x2xi32, #tpu.memory_space<smem>>
    %28 = arith.sitofp %27 : i32 to f32
    %cst_16 = arith.constant 5.000000e-01 : f32
    %29 = arith.mulf %28, %cst_16 : f32
    %cst_17 = arith.constant 0.000000e+00 : f32
    %30 = vector.broadcast %26 : f32 to vector<8x128xf32>
    %31 = vector.broadcast %cst_17 : f32 to vector<8x128xf32>
    %32 = arith.select %23, %30, %31 : vector<8x128xi1>, vector<8x128xf32>
    %33 = arith.addf %16, %32 : vector<8x128xf32>
    %cst_18 = arith.constant 0.000000e+00 : f32
    %34 = vector.broadcast %29 : f32 to vector<8x128xf32>
    %35 = vector.broadcast %cst_18 : f32 to vector<8x128xf32>
    %36 = arith.select %23, %34, %35 : vector<8x128xi1>, vector<8x128xf32>
    %37 = arith.addf %20, %36 : vector<8x128xf32>
    %c2_19 = arith.constant 2 : index
    %38 = memref.load %arg2[%c2_19] : memref<3xf32, #tpu.memory_space<smem>>
    %39 = vector.broadcast %38 : f32 to vector<8x128xf32>
    %40 = arith.cmpf oeq, %1, %39 : vector<8x128xf32>
    %c2_20 = arith.constant 2 : index
    %c0_21 = arith.constant 0 : index
    %41 = memref.load %arg1[%c2_20, %c0_21] : memref<3x2xi32, #tpu.memory_space<smem>>
    %42 = arith.sitofp %41 : i32 to f32
    %cst_22 = arith.constant 5.000000e-01 : f32
    %43 = arith.mulf %42, %cst_22 : f32
    %c2_23 = arith.constant 2 : index
    %c1_24 = arith.constant 1 : index
    %44 = memref.load %arg1[%c2_23, %c1_24] : memref<3x2xi32, #tpu.memory_space<smem>>
    %45 = arith.sitofp %44 : i32 to f32
    %cst_25 = arith.constant 5.000000e-01 : f32
    %46 = arith.mulf %45, %cst_25 : f32
    %cst_26 = arith.constant 0.000000e+00 : f32
    %47 = vector.broadcast %43 : f32 to vector<8x128xf32>
    %48 = vector.broadcast %cst_26 : f32 to vector<8x128xf32>
    %49 = arith.select %40, %47, %48 : vector<8x128xi1>, vector<8x128xf32>
    %50 = arith.addf %33, %49 : vector<8x128xf32>
    %cst_27 = arith.constant 0.000000e+00 : f32
    %51 = vector.broadcast %46 : f32 to vector<8x128xf32>
    %52 = vector.broadcast %cst_27 : f32 to vector<8x128xf32>
    %53 = arith.select %40, %51, %52 : vector<8x128xi1>, vector<8x128xf32>
    %54 = arith.addf %37, %53 : vector<8x128xf32>
    %c0_28 = arith.constant 0 : index
    %c0_29 = arith.constant 0 : index
    %c0_30 = arith.constant 0 : index
    %55 = vector.load %arg3[%c0_28, %c0_29, %c0_30] : memref<3x8x128xf32, #tpu.memory_space<vmem>>, vector<1x8x128xf32>
    %56 = vector.shape_cast %55 : vector<1x8x128xf32> to vector<8x128xf32>
    %57 = arith.addf %56, %50 : vector<8x128xf32>
    %c0_31 = arith.constant 0 : index
    %c0_32 = arith.constant 0 : index
    %c0_33 = arith.constant 0 : index
    %58 = vector.load %arg4[%c0_31, %c0_32, %c0_33] : memref<3x8x128xf32, #tpu.memory_space<vmem>>, vector<1x8x128xf32>
    %59 = vector.shape_cast %58 : vector<1x8x128xf32> to vector<8x128xf32>
    %60 = vector.shape_cast %57 : vector<8x128xf32> to vector<1x8x128xf32>
    tpu.vector_store %arg4[%c0_31, %c0_32, %c0_33], %60 {strides = array<i32>} : memref<3x8x128xf32, #tpu.memory_space<vmem>>, vector<1x8x128xf32>,
    %c1_34 = arith.constant 1 : index
    %c0_35 = arith.constant 0 : index
    %c0_36 = arith.constant 0 : index
    %61 = vector.load %arg3[%c1_34, %c0_35, %c0_36] : memref<3x8x128xf32, #tpu.memory_space<vmem>>, vector<1x8x128xf32>
    %62 = vector.shape_cast %61 : vector<1x8x128xf32> to vector<8x128xf32>
    %63 = arith.addf %62, %54 : vector<8x128xf32>
    %c1_37 = arith.constant 1 : index
    %c0_38 = arith.constant 0 : index
    %c0_39 = arith.constant 0 : index
    %64 = vector.load %arg4[%c1_37, %c0_38, %c0_39] : memref<3x8x128xf32, #tpu.memory_space<vmem>>, vector<1x8x128xf32>
    %65 = vector.shape_cast %64 : vector<1x8x128xf32> to vector<8x128xf32>
    %66 = vector.shape_cast %63 : vector<8x128xf32> to vector<1x8x128xf32>
    tpu.vector_store %arg4[%c1_37, %c0_38, %c0_39], %66 {strides = array<i32>} : memref<3x8x128xf32, #tpu.memory_space<vmem>>, vector<1x8x128xf32>,
    %c2_40 = arith.constant 2 : index
    %c0_41 = arith.constant 0 : index
    %c0_42 = arith.constant 0 : index
    %67 = vector.load %arg4[%c2_40, %c0_41, %c0_42] : memref<3x8x128xf32, #tpu.memory_space<vmem>>, vector<1x8x128xf32>
    %68 = vector.shape_cast %67 : vector<1x8x128xf32> to vector<8x128xf32>
    %69 = vector.shape_cast %1 : vector<8x128xf32> to vector<1x8x128xf32>
    tpu.vector_store %arg4[%c2_40, %c0_41, %c0_42], %69 {strides = array<i32>} : memref<3x8x128xf32, #tpu.memory_space<vmem>>, vector<1x8x128xf32>,
    return
  }
  func.func @transform_0(%arg0: i32, %arg1: memref<3x2xi32, #tpu.memory_space<smem>>, %arg2: memref<3xf32, #tpu.memory_space<smem>>) -> (i32, i32, i32) {
    %c0_i32 = arith.constant 0 : i32
    %c0_i32_0 = arith.constant 0 : i32
    %c0_i32_1 = arith.constant 0 : i32
    return %c0_i32, %arg0, %c0_i32_0 : i32, i32, i32
  }
  func.func @transform_1(%arg0: i32, %arg1: memref<3x2xi32, #tpu.memory_space<smem>>, %arg2: memref<3xf32, #tpu.memory_space<smem>>) -> (i32, i32, i32) {
    %c0_i32 = arith.constant 0 : i32
    %c0_i32_0 = arith.constant 0 : i32
    %c0_i32_1 = arith.constant 0 : i32
    return %c0_i32, %arg0, %c0_i32_0 : i32, i32, i32
  }
}

</mosaic_0001>

<bundles_post_ra>
// kernel: _apply_translation_impl.1
= control target key start
LH: loop header
LB: loop body
LE: loop exit
PB: predicated region body
PF: predicated region fallthrough
CT: control target
= control target key end

     0   :  { %s190_s0 = inlined_call_operand.vmem [shape: s32[3,2], index: 0, kind: input, shape index: {}]   ;;  %s191_s2 = inlined_call_operand.vmem [shape: f32[3,8,128], index: 2, kind: input, shape index: {}, may-alias: {2,3}]   ;;  %s192_s3 = inlined_call_operand.vmem [shape: f32[3,8,128], index: 3, kind: output, shape index: {}, may-alias: {2,3}]   ;;  %s193_s1 = inlined_call_operand.vmem [shape: f32[3], index: 1, kind: input, shape index: {}]  }
   0x1   :  { %s8_s14 = sshll.u32 %s190_s0, 4  ;;  %s12_s17 = sshll.u32 %s193_s1, 4  ;;  %s9_s14 = int_to_ptr.vmem [resolvable:$true] %s8_s14  ;;  %s13_s17 = int_to_ptr.vmem [resolvable:$true] %s12_s17 }
   0x2   :  { %s94_s18 = scalar_lea.vmem %s9_s14, 64  ;;  %p99_p1 = scmp.lt.s32.totalorder %s9_s14, %s9_s14 }
   0x3   :  { %p95_p0 = scmp.ne.s32.totalorder %s9_s14, %s94_s18  ;;  %p100_p2 = scmp.lt.s32.totalorder %s94_s18, %s94_s18 }
   0x5   :  { %p101_p3 = por %p100_p2, %p99_p1 }
   0x7   :  { %p102_p4 = pnand %p101_p3, %p95_p0 }
   0x9   :  { %105 = shalt.err (!%p102_p4)  }
   0xa   :  { %s120_s19 = smov [#allocation3]   ;;  %s106_s20 = scalar_lea.vmem %s13_s17, 16 }
   0xb   :  { %11 = dma.vmem_to_smem %s9_s14, 64, %s120_s19, [#allocation2] }
   0xc   :  { %p107_p5 = scmp.ne.s32.totalorder %s13_s17, %s106_s20  ;;  %p111_p6 = scmp.lt.s32.totalorder %s13_s17, %s13_s17 }
   0xd   :  { %p112_p7 = scmp.lt.s32.totalorder %s106_s20, %s106_s20 }
   0xf   :  { %p113_p8 = por %p112_p7, %p111_p6 }
  0x11   :  { %p114_p9 = pnand %p113_p8, %p107_p5 }
  0x13   :  { %117 = shalt.err (!%p114_p9)  }
  0x14   :  { %s121_s0 = smov [#allocation4]  }
  0x15   :  { %15 = dma.vmem_to_smem %s13_s17, 16, %s121_s0, [#allocation2] }
  0x16   :  { %118 = dma.done.wait [#allocation2], 80 }
  0x17   :  { %119 = vsyncadd [#allocation2], 4294967216 }
  0x18   :  { %17 = sfence }
  0x19   :  { %v81_v0 = vld [vmem:[%s191_s2 + $0x10] sm:$0xff]  ;;  %s22_s22 = sld [smem:[#allocation4]]  ;;  %s83_s24 = sld [smem:[#allocation4 + $0x1]] }
  0x1a   :  { %s25_s23 = sld [smem:[#allocation3]]  ;;  %91 = vst [vmem:[%s192_s3 + $0x10] sm:$0xff] %v81_v0  ;;  %s86_s28 = sld [smem:[#allocation4 + $0x2]] }
  0x1b   :  { %s84_s25 = sld [smem:[#allocation3 + $0x80]]  ;;  %s82_s30 = sld [smem:[#allocation3 + $0x1]] }
  0x1c   :  { %s87_s29 = sld [smem:[#allocation3 + $0x100]]  ;;  %s85_s4 = sld [smem:[#allocation3 + $0x81]] }
  0x1d   :  { %s88_s5 = sld [smem:[#allocation3 + $0x101]] }
  0x1f   :  { %v23_v1 = vstv %s22_s22  ;;  %v38_v2 = vstv %s83_s24 }
  0x20   :  { %s26_s6 = scvt.s32.f32 %s25_s23  ;;  %vm154_vm0 = vcmp.eq.f32.partialorder %v81_v0, %v23_v1  ;;  %v53_v4 = vstv %s86_s28  ;;  %vm158_vm1 = vcmp.eq.f32.partialorder %v81_v0, %v38_v2 }
  0x21   :  { %s41_s7 = scvt.s32.f32 %s84_s25  ;;  %s29_s11 = scvt.s32.f32 %s82_s30  ;;  %vm162_vm2 = vcmp.eq.f32.partialorder %v81_v0, %v53_v4  ;;  %v67_v15 = vld [vmem:[%s191_s2] sm:$0xff]  ;;  %v89_v24 = vld [vmem:[%s191_s2 + $0x8] sm:$0xff] }
  0x22   :  { %s27_s8 = smul.f32 0.5, %s26_s6  ;;  %s56_s9 = scvt.s32.f32 %s87_s29 }
  0x23   :  { %s42_s10 = smul.f32 0.5, %s41_s7  ;;  %s44_s13 = scvt.s32.f32 %s85_s4 }
  0x24   :  { %v31_v6 = vstv %s27_s8  ;;  %s57_s12 = smul.f32 0.5, %s56_s9  ;;  %s59_s15 = scvt.s32.f32 %s88_s5 }
  0x25   :  { %v32_v8 = vsel %vm154_vm0, %v31_v6, 0.0  ;;  %v46_v9 = vstv %s42_s10  ;;  %s30_s14 = smul.f32 0.5, %s29_s11 }
  0x26   :  { %v47_v10 = vsel %vm158_vm1, %v46_v9, 0.0  ;;  %v61_v11 = vstv %s57_s12  ;;  %s45_s16 = smul.f32 0.5, %s44_s13 }
  0x27   :  { %v48_v12 = vadd.f32 %v47_v10, %v32_v8  ;;  %v62_v13 = vsel %vm162_vm2, %v61_v11, 0.0  ;;  %v34_v14 = vstv %s30_s14  ;;  %s60_s17 = smul.f32 0.5, %s59_s15 }
  0x28   :  { %v35_v16 = vsel %vm154_vm0, %v34_v14, 0.0  ;;  %v49_v17 = vstv %s45_s16 }
  0x29   :  { %v63_v18 = vadd.f32 %v62_v13, %v48_v12  ;;  %v50_v19 = vsel %vm158_vm1, %v49_v17, 0.0  ;;  %v64_v20 = vstv %s60_s17 }
  0x2a   :  { %v51_v21 = vadd.f32 %v50_v19, %v35_v16  ;;  %v65_v22 = vsel %vm162_vm2, %v64_v20, 0.0 }
  0x2b   :  { %v68_v23 = vadd.f32 %v67_v15, %v63_v18 }
  0x2c   :  { %v66_v25 = vadd.f32 %v65_v22, %v51_v21 }
  0x2d   :  { %69 = vst [vmem:[%s192_s3] sm:$0xff] %v68_v23 }
  0x2e   :  { %v72_v26 = vadd.f32 %v89_v24, %v66_v25 }
  0x30   :  { %90 = vst [vmem:[%s192_s3 + $0x8] sm:$0xff] %v72_v26 }

</bundles_post_ra>
